<compile_context>
chip_gen: v7x
topology: tpu7x:2x2x1
jax: 0.10.0
libtpu: 0.0.40
codegen_flags: <defaults>
</compile_context>

<pallas_src>
import jax
import jax.numpy as jnp
from jax.experimental import pallas as pl
from jax.experimental.pallas import tpu as pltpu


# ------------------------------ Pallas kernel ------------------------------ #

def _conv_taps_kernel(xm1_ref, x0_ref, xp1_ref, w_ref, b_ref, o_ref):
    # xm1/x0/xp1: [TM, c_in] row tiles of x[t-1], x[t], x[t+1]
    # w:          [3, c_in, d_model] resident weight taps
    # b:          [1, d_model] resident f32 bias
    acc = jnp.dot(xm1_ref[...], w_ref[0], preferred_element_type=jnp.float32)
    acc = acc + jnp.dot(x0_ref[...], w_ref[1], preferred_element_type=jnp.float32)
    acc = acc + jnp.dot(xp1_ref[...], w_ref[2], preferred_element_type=jnp.float32)
    o_ref[...] = (acc + b_ref[...]).astype(o_ref.dtype)


# ------------------------------ host wrappers ------------------------------ #

def _round_up(x, m):
    return ((x + m - 1) // m) * m


def prepare_token_embedding_params(conv_w, conv_b):
    """Hoisted once per model (not per forward).

    conv_w: [d_model, c_in, 3] (PyTorch Conv1d layout), conv_b: [d_model].
    Returns (w_taps [3, c_in, d_model], bias2d [1, d_model] f32), where
    w_taps[k] = conv_w[:, :, k].T so tap k multiplies x[t-1+k].
    """
    d_model, c_in, k = conv_w.shape
    assert k == 3, "TokenEmbedding uses kernel_size=3"
    w_taps = jnp.transpose(conv_w, (2, 1, 0))            # [3, c_in, d_model]
    bias2d = conv_b.reshape(1, d_model).astype(jnp.float32)
    return w_taps, bias2d


def token_embedding_forward(x, w_taps, bias2d, *, tm_max=1024,
                            compute_dtype=jnp.bfloat16, out_dtype=None):
    """x: [B, L, c_in] -> [B, L, d_model] (channels-last; no NCW tensor built).

    compute_dtype: dtype fed to the MXU (bf16 default; accumulation stays f32).
    out_dtype:     output dtype (defaults to x.dtype).
    """
    b, l, c_in = x.shape
    k, c_in_w, d_model = w_taps.shape
    assert k == 3 and c_in_w == c_in
    out_dtype = x.dtype if out_dtype is None else out_dtype

    # Cast to the (narrow) compute dtype BEFORE rolling so the shifted copies
    # written to HBM are half-width too.
    xc = x.astype(compute_dtype)
    wc = w_taps.astype(compute_dtype)
    bias2d = bias2d.astype(jnp.float32)

    # Circular taps (k=3, pad=1, stride=1): two rolls, no 3x-wide im2col buffer.
    # (The wrap-around halo cannot be expressed by a BlockSpec index_map.)
    n = b * l
    xm1 = jnp.roll(xc, 1, axis=1).reshape(n, c_in)    # x[t-1], wraps 0 -> L-1
    x0 = xc.reshape(n, c_in)                          # x[t]
    xp1 = jnp.roll(xc, -1, axis=1).reshape(n, c_in)   # x[t+1], wraps L-1 -> 0

    # Row tile: multiple of 16 (sublane-pack-safe for bf16 and f32).
    align = 16
    tm_max = _round_up(tm_max, align)
    if n < 2 * align:
        tm = n                      # tiny problem: one full-extent block
    else:
        # >=2 blocks whenever possible so both v7x TensorCores get work.
        tm = min(tm_max, _round_up(pl.cdiv(n, 2), align))
    grid = (pl.cdiv(n, tm),)        # ragged last tile: OOB writes are discarded

    in_bytes = jnp.dtype(compute_dtype).itemsize
    out_bytes = jnp.dtype(out_dtype).itemsize
    cost = pl.CostEstimate(
        flops=2 * n * (3 * c_in) * d_model,
        transcendentals=0,
        bytes_accessed=(3 * n * c_in + 3 * c_in * d_model) * in_bytes
                       + d_model * 4 + n * d_model * out_bytes,
    )

    out = pl.pallas_call(
        _conv_taps_kernel,
        out_shape=jax.ShapeDtypeStruct((n, d_model), out_dtype),
        grid_spec=pltpu.PrefetchScalarGridSpec(
            num_scalar_prefetch=0,
            grid=grid,
            in_specs=[
                pl.BlockSpec((tm, c_in), lambda i: (i, 0)),            # x[t-1] rows
                pl.BlockSpec((tm, c_in), lambda i: (i, 0)),            # x[t]   rows
                pl.BlockSpec((tm, c_in), lambda i: (i, 0)),            # x[t+1] rows
                pl.BlockSpec((3, c_in, d_model), lambda i: (0, 0, 0)),  # resident W taps
                pl.BlockSpec((1, d_model), lambda i: (0, 0)),           # resident bias
            ],
            out_specs=pl.BlockSpec((tm, d_model), lambda i: (i, 0)),
        ),
        compiler_params=pltpu.CompilerParams(
            dimension_semantics=("parallel",),     # megacore / v7x 2-TC split
            vmem_limit_bytes=48 * 1024 * 1024,     # big tiles OK; ~25% headroom on v7x
        ),
        cost_estimate=cost,
    )(xm1, x0, xp1, wc, bias2d)
    return out.reshape(b, l, d_model)


# ------------------------------ pure-JAX reference ------------------------- #

def token_embedding_ref(x, conv_w, conv_b):
    xm1 = jnp.roll(x, 1, axis=1)
    xp1 = jnp.roll(x, -1, axis=1)
    w0, w1, w2 = conv_w[:, :, 0].T, conv_w[:, :, 1].T, conv_w[:, :, 2].T
    return xm1 @ w0 + x @ w1 + xp1 @ w2 + conv_b


# ----------------------------------- test ----------------------------------- #

if __name__ == "__main__":
    # d_model = 128 -> lane-dense (unmasked) output stores.
    B, L, c_in, d_model = 2, 16, 4, 128

    key = jax.random.PRNGKey(0)
    kx, kw, kb = jax.random.split(key, 3)
    x = jax.random.normal(kx, (B, L, c_in), jnp.float32)
    conv_w = 0.1 * jax.random.normal(kw, (d_model, c_in, 3), jnp.float32)
    conv_b = 0.1 * jax.random.normal(kb, (d_model,), jnp.float32)

    w_taps, bias2d = prepare_token_embedding_params(conv_w, conv_b)
    ref = token_embedding_ref(x, conv_w, conv_b)

    # Exact f32 path.  n = B*L = 32 rows -> tm = 16 -> grid of 2 blocks, so the
    # tiled / 2-TensorCore path is exercised even at this toy size.
    y32 = token_embedding_forward(x, w_taps, bias2d, compute_dtype=jnp.float32)
    y32 = jax.block_until_ready(y32)
    assert y32.shape == (B, L, d_model), y32.shape
    err32 = float(jnp.max(jnp.abs(y32 - ref)))
    assert jnp.allclose(y32, ref, atol=3e-5, rtol=3e-5), err32

    # Default bf16-fed MXU path (f32 accumulation + f32 bias, f32 output).
    ybf = token_embedding_forward(x, w_taps, bias2d)
    ybf = jax.block_until_ready(ybf)
    assert ybf.shape == (B, L, d_model), ybf.shape
    assert ybf.dtype == x.dtype
    errbf = float(jnp.max(jnp.abs(ybf.astype(jnp.float32) - ref)))
    assert jnp.allclose(ybf.astype(jnp.float32), ref, atol=5e-2, rtol=5e-2), errbf
    assert bool(jnp.isfinite(ybf).all())

    print("KERNEL_OK")
</pallas_src>

<mosaic_0001>
module attributes {stable_mosaic.version = 11 : i64} {
  func.func @_conv_taps_kernel(%arg0: i32, %arg1: memref<16x4xf32, #tpu.memory_space<vmem>>, %arg2: memref<16x4xf32, #tpu.memory_space<vmem>>, %arg3: memref<16x4xf32, #tpu.memory_space<vmem>>, %arg4: memref<3x4x128xf32, #tpu.memory_space<vmem>>, %arg5: memref<1x128xf32, #tpu.memory_space<vmem>>, %arg6: memref<16x128xf32, #tpu.memory_space<vmem>>) attributes {dimension_semantics = [#tpu.dimension_semantics<parallel>], iteration_bounds = array<i64: 2>, scalar_prefetch = 0 : i64, scratch_operands = 0 : i64, tpu.core_type = #tpu.core_type<tc>, window_params = [{transform_indices = @transform_0, window_bounds = array<i64: 16, 4>}, {transform_indices = @transform_1, window_bounds = array<i64: 16, 4>}, {transform_indices = @transform_2, window_bounds = array<i64: 16, 4>}, {pipeline_mode = #tpu.pipeline_mode<synchronous>, transform_indices = @transform_3, window_bounds = array<i64: 3, 4, 128>}, {pipeline_mode = #tpu.pipeline_mode<synchronous>, transform_indices = @transform_4, window_bounds = array<i64: 1, 128>}, {transform_indices = @transform_5, window_bounds = array<i64: 16, 128>}]} {
    %c0 = arith.constant 0 : index
    %c0_0 = arith.constant 0 : index
    %0 = vector.load %arg1[%c0, %c0_0] : memref<16x4xf32, #tpu.memory_space<vmem>>, vector<16x4xf32>
    %c0_1 = arith.constant 0 : index
    %c0_2 = arith.constant 0 : index
    %c0_3 = arith.constant 0 : index
    %1 = vector.load %arg4[%c0_1, %c0_2, %c0_3] : memref<3x4x128xf32, #tpu.memory_space<vmem>>, vector<1x4x128xf32>
    %2 = vector.shape_cast %1 : vector<1x4x128xf32> to vector<4x128xf32>
    %cst = arith.constant dense<0.000000e+00> : vector<16x128xf32>
    %3 = tpu.matmul %0, %2, %cst {dimension_numbers = #tpu.dot_dimension_numbers<[1], [0], [0], [1], [0, 0, 1, 1], [], []>} : vector<16x4xf32>, vector<4x128xf32>, vector<16x128xf32> -> vector<16x128xf32>
    %c0_4 = arith.constant 0 : index
    %c0_5 = arith.constant 0 : index
    %4 = vector.load %arg2[%c0_4, %c0_5] : memref<16x4xf32, #tpu.memory_space<vmem>>, vector<16x4xf32>
    %c1 = arith.constant 1 : index
    %c0_6 = arith.constant 0 : index
    %c0_7 = arith.constant 0 : index
    %5 = vector.load %arg4[%c1, %c0_6, %c0_7] : memref<3x4x128xf32, #tpu.memory_space<vmem>>, vector<1x4x128xf32>
    %6 = vector.shape_cast %5 : vector<1x4x128xf32> to vector<4x128xf32>
    %cst_8 = arith.constant dense<0.000000e+00> : vector<16x128xf32>
    %7 = tpu.matmul %4, %6, %cst_8 {dimension_numbers = #tpu.dot_dimension_numbers<[1], [0], [0], [1], [0, 0, 1, 1], [], []>} : vector<16x4xf32>, vector<4x128xf32>, vector<16x128xf32> -> vector<16x128xf32>
    %8 = arith.addf %3, %7 : vector<16x128xf32>
    %c0_9 = arith.constant 0 : index
    %c0_10 = arith.constant 0 : index
    %9 = vector.load %arg3[%c0_9, %c0_10] : memref<16x4xf32, #tpu.memory_space<vmem>>, vector<16x4xf32>
    %c2 = arith.constant 2 : index
    %c0_11 = arith.constant 0 : index
    %c0_12 = arith.constant 0 : index
    %10 = vector.load %arg4[%c2, %c0_11, %c0_12] : memref<3x4x128xf32, #tpu.memory_space<vmem>>, vector<1x4x128xf32>
    %11 = vector.shape_cast %10 : vector<1x4x128xf32> to vector<4x128xf32>
    %cst_13 = arith.constant dense<0.000000e+00> : vector<16x128xf32>
    %12 = tpu.matmul %9, %11, %cst_13 {dimension_numbers = #tpu.dot_dimension_numbers<[1], [0], [0], [1], [0, 0, 1, 1], [], []>} : vector<16x4xf32>, vector<4x128xf32>, vector<16x128xf32> -> vector<16x128xf32>
    %13 = arith.addf %8, %12 : vector<16x128xf32>
    %c0_14 = arith.constant 0 : index
    %c0_15 = arith.constant 0 : index
    %14 = vector.load %arg5[%c0_14, %c0_15] : memref<1x128xf32, #tpu.memory_space<vmem>>, vector<1x128xf32>
    %15 = vector.broadcast %14 : vector<1x128xf32> to vector<16x128xf32>
    %16 = arith.addf %13, %15 : vector<16x128xf32>
    %c0_16 = arith.constant 0 : index
    %c0_17 = arith.constant 0 : index
    %17 = vector.load %arg6[%c0_16, %c0_17] : memref<16x128xf32, #tpu.memory_space<vmem>>, vector<16x128xf32>
    tpu.vector_store %arg6[%c0_16, %c0_17], %16 {strides = array<i32>} : memref<16x128xf32, #tpu.memory_space<vmem>>, vector<16x128xf32>,
    return
  }
  func.func @transform_0(%arg0: i32) -> (i32, i32) {
    %c0_i32 = arith.constant 0 : i32
    %c0_i32_0 = arith.constant 0 : i32
    return %arg0, %c0_i32 : i32, i32
  }
  func.func @transform_1(%arg0: i32) -> (i32, i32) {
    %c0_i32 = arith.constant 0 : i32
    %c0_i32_0 = arith.constant 0 : i32
    return %arg0, %c0_i32 : i32, i32
  }
  func.func @transform_2(%arg0: i32) -> (i32, i32) {
    %c0_i32 = arith.constant 0 : i32
    %c0_i32_0 = arith.constant 0 : i32
    return %arg0, %c0_i32 : i32, i32
  }
  func.func @transform_3(%arg0: i32) -> (i32, i32, i32) {
    %c0_i32 = arith.constant 0 : i32
    %c0_i32_0 = arith.constant 0 : i32
    %c0_i32_1 = arith.constant 0 : i32
    %c0_i32_2 = arith.constant 0 : i32
    return %c0_i32, %c0_i32_0, %c0_i32_1 : i32, i32, i32
  }
  func.func @transform_4(%arg0: i32) -> (i32, i32) {
    %c0_i32 = arith.constant 0 : i32
    %c0_i32_0 = arith.constant 0 : i32
    %c0_i32_1 = arith.constant 0 : i32
    return %c0_i32, %c0_i32_0 : i32, i32
  }
  func.func @transform_5(%arg0: i32) -> (i32, i32) {
    %c0_i32 = arith.constant 0 : i32
    %c0_i32_0 = arith.constant 0 : i32
    return %arg0, %c0_i32 : i32, i32
  }
}

</mosaic_0001>

<bundles_post_ra>
// kernel: tpu_custom_call.1
= control target key start
LH: loop header
LB: loop body
LE: loop exit
PB: predicated region body
PF: predicated region fallthrough
CT: control target
= control target key end

     0   :  { %10 = vsyncpa [#allocation3], 0  ;;  %s975_s0 = inlined_call_operand.vmem [shape: f32[32,4], index: 0, kind: input, shape index: {}]   ;;  %s976_s1 = inlined_call_operand.vmem [shape: f32[32,4], index: 1, kind: input, shape index: {}]   ;;  %s977_s2 = inlined_call_operand.vmem [shape: f32[32,4], index: 2, kind: input, shape index: {}]   ;;  %s978_s3 = inlined_call_operand.vmem [shape: f32[3,4,128], index: 3, kind: input, shape index: {}]   ;;  %s979_s4 = inlined_call_operand.vmem [shape: f32[1,128], index: 4, kind: input, shape index: {}]   ;;  %s980_s5 = inlined_call_operand.hbm [shape: f32[32,128], index: 5, kind: output, shape index: {}]  }
   0x1   :  { %12 = vsyncpa [#allocation3 + $0x1], 0  ;;  %s843_s18 = smov 0   ;;  %s845_s19 = smov 0  }
   0x2   :  { %s847_s20 = smov 0   ;;  %s849_s21 = smov 0  }
   0x3 LB: > { %s864_s22 = sadd.s32 4294967295, %s808_s21   ;;  %s648_s23 = sadd.s32 4294967294, %s808_s21   ;;  %s808_s21 = sphi %s849_s21, %s986_s21   ;;  %s804_s20 = sphi %s847_s20, %s985_s20   ;;  %s800_s19 = sphi %s845_s19, %s984_s19   ;;  %s796_s18 = sphi %s843_s18, %s983_s18  }
   0x4   : > { %s868_s24 = sadd.s32 1, %s808_s21   ;;  %s145_s25 = sadd.s32 1, %s804_s20 }
   0x5   : > { %s142_s26 = ssub.s32 %s808_s21, %s868_s24  ;;  %p155_p0 = scmp.ne.s32.totalorder %s804_s20, %s800_s19 }
   0x6   : > { %p143_p1 = scmp.eq.s32.totalorder %s142_s26, 0  ;;  %p156_p2 = scmp.eq.s32.totalorder %s864_s22, 1 }
   0x7   : > { %p161_p3 = scmp.ne.s32.totalorder %s800_s19, %s796_s18  ;;  %p162_p4 = scmp.eq.s32.totalorder %s648_s23, 1 }
   0x8   : > { %s879_s27 = scalar_select %p143_p1, %s804_s20, %s145_s25  }
   0x9   : > { %p881_p5 = por %p156_p2, %p155_p0  ;;  %p885_p6 = por %p162_p4, %p161_p3 }
   0xa   : > { %p651_p7 = scmp.ge.s32.totalorder %s808_s21, 1  ;;  %p213_p8 = scmp.lt.s32.totalorder %s808_s21, 3 }
   0xc   : > { %p214_p9 = pnand %p651_p7, %p213_p8 }
   0xd   : > { %v272_v0 = vld [vmem:[%s978_s3] sm:$0xf] (!%p214_p9)  ;;  %vm284_vm0 = vcmask (!%p214_p9), 1043456   ;;  %s653_s7 = sshll.u32 (!%p214_p9), %s864_s22, 1  ;;  %v666_v1 = vld [vmem:[%s978_s3 + $0x8] sm:$0xf] (!%p214_p9) }
   0xe   : > { %217 = sbr.rel (%p214_p9) target bundleno = 266 (0x10a), region = 40  ;;  %691 = vmatprep.subr.msk.mxu0 (!%p214_p9), %vm284_vm0, %v272_v0  ;;  %p252_p10 = scmp.lt.s32.totalorder (!%p214_p9), %s653_s7, 3  ;;  %v659_v2 = vld [vmem:[%s978_s3 + $0x4] sm:$0xf] (!%p214_p9)  ;;  %vm277_vm1 = vcmask (!%p214_p9), 31744  }
   0xf   : > { %692 = vmatpush3.msk.msra.mxu0 (!%p214_p9), %vm284_vm0, %v272_v0  ;;  %686 = vmatprep.subr.msk.mxu1 (!%p214_p9), %vm284_vm0, %v659_v2  ;;  %s248_s6 = sand.u32 (!%p214_p9), 1, %s800_s19   ;;  %v670_v12 = vld [vmem:[%s979_s4] ss:$0 sm:$0xff] (!%p214_p9)  ;;  %s810_s17 = smov (!%p214_p9), [#allocation2]  }
  0x10   : > { %696 = vmatprep.subr.msk.mxu0 (!%p214_p9), %vm284_vm0, %v666_v1  ;;  %687 = vmatpush3.msk.msra.mxu1 (!%p214_p9), %vm284_vm0, %v659_v2  ;;  %s934_s16 = scalar_lea.sflag (!%p214_p9), [#allocation3], %s248_s6 }
  0x15   : > { %s988_s7 = smov (!%p252_p10, %s653_s7), 3 }
  0x16   : > { %s654_s12 = sshll.u32 %s988_s7, 3  ;;  %s652_s7 = sshll.u32 %s248_s6, 4 }
  0x17   : > { %s255_s15 = scalar_lea.vmem %s975_s0, %s654_s12  ;;  %s261_s23 = scalar_lea.vmem %s976_s1, %s654_s12 }
  0x18   : > { %v270_v3 = vld [vmem:[%s255_s15] sm:$0xff]  ;;  %v271_v4 = vld [vmem:[%s255_s15 + $0x8] sm:$0xff]  ;;  %s267_s30 = scalar_lea.vmem %s977_s2, %s654_s12  ;;  %s250_s10 = scalar_lea.vmem [#allocation2], %s652_s7 }
  0x19   : > { %v273_v5 = vld [vmem:[%s261_s23] sm:$0xff]  ;;  %693 = vmatprep.mubr.msk.f32.mxu0 %vm277_vm1, %v270_v3  ;;  %v274_v6 = vld [vmem:[%s261_s23 + $0x8] sm:$0xff]  ;;  %s562_s11 = sshll.u32 %s250_s10, 4  ;;  %s676_s12 = sshll.u32 %s864_s22, 8  ;;  %s927_s11 = int_to_ptr.vmem [resolvable:$true] %s562_s11 }
  0x1a   : > { %688 = vmatprep.mubr.msk.f32.mxu1 %vm277_vm1, %v273_v5  ;;  %v447_v7 = vld [vmem:[%s267_s30] sm:$0xff]  ;;  %694 = vmatmul.mubr.msk.f32.vlgmr.msra.gmra.mrb[0].mxu0 %vm277_vm1, %v271_v4  ;;  %v448_v8 = vld [vmem:[%s267_s30 + $0x8] sm:$0xff]  ;;  %s932_s15 = scalar_lea.hbm %s980_s5, %s676_s12  ;;  %s746_s22 = scalar_lea.vmem %s927_s11, 256 }
  0x1b   : > { %689 = vmatmul.mubr.msk.f32.vlgmr.msra.gmra.mrb[0].mxu1 %vm277_vm1, %v274_v6  ;;  %697 = vmatpush3.msk.msra.mxu0 %vm284_vm0, %v666_v1  ;;  %p747_p11 = scmp.ne.s32.totalorder %s927_s11, %s746_s22  ;;  %s750_s23 = sshll.u32 %s810_s17, 4  ;;  %s751_s23 = int_to_ptr.vmem [resolvable:$false] %s750_s23 }
  0x1c   : > { %698 = vmatprep.mubr.msk.f32.mxu0 %vm277_vm1, %v447_v7  ;;  %s752_s25 = scalar_lea.vmem %s751_s23, 512  ;;  %p753_p0 = scmp.lt.s32.totalorder %s927_s11, %s751_s23 }
  0x1d   : > { %p748_p12 = pnand %p747_p11, %p881_p5  ;;  %p754_p1 = scmp.lt.s32.totalorder %s752_s25, %s746_s22 }
  0x1f   : > { %p749_p13 = pneg %p748_p12  ;;  %p755_p2 = por %p754_p1, %p753_p0 }
  0x21   : > { %p756_p3 = pnand %p755_p2, %p749_p13 }
  0x22   : > { %699 = vmatmul.mubr.msk.f32.vlgmr.msra.gmra.mrb[0].mxu0 %vm277_vm1, %v448_v8 }
  0xee   : > { %v690_v9 = vpop.f32.mrb[0].mxu1 }
  0xef   : > { %v354_v10 = vpop.f32.mrb[1].mxu1 }
  0xf5   : > { %v700_v11 = vpop.f32.mrb[0].mxu0 }
  0xf6   : > { %v701_v13 = vadd.f32 %v700_v11, %v690_v9  ;;  %v526_v14 = vpop.f32.mrb[1].mxu0 }
  0xf7   : > { %v702_v15 = vadd.f32 %v526_v14, %v354_v10 }
  0xf8   : > { %v545_v16 = vadd.f32 %v701_v13, %v670_v12 }
  0xf9   : > { %v544_v17 = vadd.f32 %v702_v15, %v670_v12 }
  0xfa   : > { %547 = vst [vmem:[%s250_s10 + $0x8] sm:$0xff] %v545_v16 }
  0xfb   : > { %546 = vst [vmem:[%s250_s10] sm:$0xff] %v544_v17 }
  0xfc   : > { %759 = shalt.err (!%p756_p3)
}
  0xfd   : > { %s760_s26 = scalar_lea.hbm %s932_s15, 256  ;;  %s764_s7 = scalar_lea.hbm %s980_s5, 512 }
  0xfe   : > { %p761_p4 = scmp.ne.s32.totalorder %s932_s15, %s760_s26  ;;  %p765_p9 = scmp.lt.u32.totalorder %s932_s15, %s980_s5 }
  0xff   : > { %p766_p10 = scmp.lt.u32.totalorder %s764_s7, %s760_s26  ;;  %p768_p12 = scmp.lt.u32.totalorder %s760_s26, %s932_s15 }
 0x100   : > { %p762_p7 = pnand %p761_p4, %p881_p5 }
 0x101   : > { %p767_p11 = por %p766_p10, %p765_p9 }
 0x102   : > { %p763_p8 = pneg %p762_p7 }
 0x103   : > { %p769_p13 = por %p768_p12, %p767_p11 }
 0x105   : > { %p770_p0 = pnand %p769_p13, %p763_p8 }
 0x107   : > { %773 = shalt.err (!%p770_p0)
}
 0x108   : > { %s811_s10 = smov 128   ;;  %s812_s12 = smov 8  }
 0x109   : > { %705 = dma.vmem_to_hbm [thread:$0]  (%p881_p5), %s927_s11, 256, %s932_s15, %s934_s16, %s811_s10, %s811_s10, %s812_s12  }
 0x10a PF: > { %p711_p1 = scmp.ge.s32.totalorder %s808_s21, 2  ;;  %s577_s13 = sand.u32 1, %s796_s18  }
 0x10b   : > { %s578_s14 = scalar_lea.sflag [#allocation3], %s577_s13 }
 0x10c   : > { %p708_p2 = pnand %p711_p1, %p885_p6 }
 0x10e   : > { %791 = dma.done.wait (!%p708_p2), %s578_s14, 256  }
 0x10f   : > { %793 = vsyncadd (!%p708_p2), %s578_s14, 4294967040  ;;  %p15_p3 = scmp.ge.s32.totalorder %s868_s24, 4   ;;  %s983_s18 = smov %s800_s19 }
 0x110   : > { %s984_s19 = smov %s804_s20  ;;  %s985_s20 = smov %s879_s27 }
 0x111   : > { %s986_s21 = smov %s868_s24  ;;  %17 = sbr.rel (!%p15_p3) target bundleno = 3 (0x3), region = 83 }
 0x118   :  { %583 = vsyncpa [#allocation3], 1 }
 0x119   :  { %585 = vsyncpa [#allocation3 + $0x1], 1 }

</bundles_post_ra>
